<compile_context>
chip_gen: v6e
topology: v6e:2x2x1
jax: 0.10.0
libtpu: 0.0.40
codegen_flags: <defaults>
</compile_context>

<pallas_src>
import functools

import jax
import jax.numpy as jnp
from jax.experimental import pallas as pl
from jax.experimental.pallas import tpu as pltpu

EPS = 1e-5          # nn.BatchNorm2d default
_SUBLANE = 8        # f32 sublane tile


def _round_up(v, m):
    return (v + m - 1) // m * m


# ------------------------------ in-kernel ops -------------------------------

def _conv3x3(a, w_ref, masks, W, L, mxu_dtype):
    """'same' 3x3 convolution of a channel-major, image-batched tile.

    a:      (Cpad, L) f32 value, L = N*H*W (lane = img*H*W + y*W + x)
    w_ref:  (Coutp, 9*Cpad) weight ref, column = (ky*3+kx)*Cpad + ci
    masks:  (8, L) 0/1 f32 border masks, one row per non-center tap.

    The 8 shifted taps are built with pltpu.roll (XLU) and zeroed outside the
    per-image border by the masks (which also kill the cross-image wraparound
    of the roll); the 9 taps are concatenated (sublane-aligned since Cpad is a
    multiple of 8) and contracted with ONE MXU matmul, f32 accumulation.
    """
    taps = []
    k = 0
    for dy in (-1, 0, 1):
        for dx in (-1, 0, 1):
            if dy == 0 and dx == 0:
                taps.append(a)
                continue
            shift = (-(dy * W + dx)) % L            # rolled[p] = a[p + dy*W + dx]
            rolled = pltpu.roll(a, shift, axis=1)
            taps.append(rolled * masks[k:k + 1, :])
            k += 1
    patches = jnp.concatenate(taps, axis=0)         # (9*Cpad, L)
    return jnp.dot(w_ref[...].astype(mxu_dtype), patches.astype(mxu_dtype),
                   preferred_element_type=jnp.float32)


def _block_kernel(x_ref, masks_ref, w1_ref, g1_ref, b1_ref, w2_ref, g2_ref,
                  b2_ref, o_ref, *, W, mxu_dtype):
    """Fully fused `_Block` forward in a single grid step."""
    L = x_ref.shape[-1]                              # N * H * W
    x = x_ref[...].astype(jnp.float32)               # (Cpad, L), stays f32
    masks = masks_ref[...]                           # (8, L) 0/1 f32

    # Stage 1: conv1 -> BN1 (batch stats, biased var) -> +x -> ReLU.
    c1 = _conv3x3(x, w1_ref, masks, W, L, mxu_dtype)
    mean1 = jnp.mean(c1, axis=1, keepdims=True)
    var1 = jnp.mean(jnp.square(c1 - mean1), axis=1, keepdims=True)
    h1 = (c1 - mean1) * jax.lax.rsqrt(var1 + EPS) * g1_ref[...] + b1_ref[...]
    a_act = jnp.maximum(x + h1, 0.0)                 # (Cpad, L) f32

    # Stage 2: conv2 -> BN2 -> 2x2 max-pool candidates -> ReLU.
    c2 = _conv3x3(a_act, w2_ref, masks, W, L, mxu_dtype)   # (Coutp, L) f32
    mean2 = jnp.mean(c2, axis=1, keepdims=True)
    var2 = jnp.mean(jnp.square(c2 - mean2), axis=1, keepdims=True)
    z = (c2 - mean2) * jax.lax.rsqrt(var2 + EPS) * g2_ref[...] + b2_ref[...]

    # 2x2 window maxima for every anchor via two lane rolls; even-(y,x)
    # anchors are decimated with a strided slice in the wrapper.
    mh = jnp.maximum(z, pltpu.roll(z, L - 1, axis=1))       # max(z[p], z[p+1])
    mv = jnp.maximum(mh, pltpu.roll(mh, L - W, axis=1))     # + rows p, p+W
    o_ref[...] = jnp.maximum(mv, 0.0).astype(o_ref.dtype)   # nl = ReLU


# ------------------------------- host wrapper -------------------------------

@functools.partial(jax.jit, static_argnames=("mxu_dtype",))
def block_forward(x_nchw, w1, g1, b1, w2, g2, b2, mxu_dtype=jnp.bfloat16):
    n, cin, h, w = x_nchw.shape
    cout = w2.shape[0]
    assert h % 2 == 0 and w % 2 == 0, "even spatial dims only (MaxPool2d(2))"
    hw = h * w
    L = n * hw
    cpad = _round_up(cin, _SUBLANE)
    coutp = _round_up(cout, _SUBLANE)

    # Channel-major, image-batched lanes: (Cpad, N*H*W).  x stays f32; only the
    # MXU operands are cast to mxu_dtype.
    x_cm = jnp.transpose(x_nchw, (1, 0, 2, 3)).reshape(cin, L).astype(jnp.float32)
    x_cm = jnp.pad(x_cm, ((0, cpad - cin), (0, 0)))

    def pack_w(wt, co_p):
        co, ci = wt.shape[0], wt.shape[1]
        wt = jnp.pad(wt, ((0, co_p - co), (0, cpad - ci), (0, 0), (0, 0)))
        # (Co_p, Ci_p, 3, 3) -> (Co_p, ky, kx, Ci_p) -> (Co_p, 9*Ci_p); column
        # order matches the kernel's tap/channel ordering of the patch matrix.
        return jnp.transpose(wt, (0, 2, 3, 1)).reshape(co_p, 9 * cpad).astype(mxu_dtype)

    def pack_affine(v, c_p):
        return jnp.pad(v.astype(jnp.float32), (0, c_p - v.shape[0])).reshape(c_p, 1)

    wm1, wm2 = pack_w(w1, cpad), pack_w(w2, coutp)
    g1c, b1c = pack_affine(g1, cpad), pack_affine(b1, cpad)
    g2c, b2c = pack_affine(g2, coutp), pack_affine(b2, coutp)

    # Precomputed 0/1 border masks (one row per non-center tap).
    lane = jnp.arange(L, dtype=jnp.int32)
    yy = (lane % hw) // w
    xx = lane % w
    rows = []
    for dy in (-1, 0, 1):
        for dx in (-1, 0, 1):
            if dy == 0 and dx == 0:
                continue
            valid = (yy + dy >= 0) & (yy + dy < h) & (xx + dx >= 0) & (xx + dx < w)
            rows.append(valid.astype(jnp.float32))
    masks = jnp.stack(rows, axis=0)                       # (8, L)

    kernel = functools.partial(_block_kernel, W=w, mxu_dtype=mxu_dtype)

    full = pl.pallas_call(
        kernel,
        out_shape=jax.ShapeDtypeStruct((coutp, L), jnp.float32),
        grid=(1,),
        in_specs=[
            pl.BlockSpec((cpad, L), lambda i: (0, 0)),          # x
            pl.BlockSpec((8, L), lambda i: (0, 0)),             # border masks
            pl.BlockSpec((cpad, 9 * cpad), lambda i: (0, 0)),   # conv1 weight
            pl.BlockSpec((cpad, 1), lambda i: (0, 0)),          # bn1 gamma
            pl.BlockSpec((cpad, 1), lambda i: (0, 0)),          # bn1 beta
            pl.BlockSpec((coutp, 9 * cpad), lambda i: (0, 0)),  # conv2 weight
            pl.BlockSpec((coutp, 1), lambda i: (0, 0)),         # bn2 gamma
            pl.BlockSpec((coutp, 1), lambda i: (0, 0)),         # bn2 beta
        ],
        out_specs=pl.BlockSpec((coutp, L), lambda i: (0, 0)),
        compiler_params=pltpu.CompilerParams(
            dimension_semantics=("arbitrary",),
            vmem_limit_bytes=32 * 1024 * 1024),
    )(x_cm, masks, wm1, g1c, b1c, wm2, g2c, b2c)

    # (Coutp, N*H*W) -> (N, Cout, H, W) -> stride-2 decimation of the pooled map.
    full = full.reshape(coutp, n, h, w)[:cout]
    full = jnp.transpose(full, (1, 0, 2, 3))
    return full[:, :, ::2, ::2]


# --------------------------- pure-JAX reference -----------------------------

def _reference(x, w1, g1, b1, w2, g2, b2):
    def conv(t, w):
        return jax.lax.conv_general_dilated(
            t, w, (1, 1), 'SAME', dimension_numbers=('NCHW', 'OIHW', 'NCHW'))

    def bn(t, g, b):
        mean = jnp.mean(t, axis=(0, 2, 3), keepdims=True)
        var = jnp.mean((t - mean) ** 2, axis=(0, 2, 3), keepdims=True)
        return ((t - mean) * jax.lax.rsqrt(var + EPS)
                * g.reshape(1, -1, 1, 1) + b.reshape(1, -1, 1, 1))

    h = x + bn(conv(x, w1), g1, b1)
    h = jnp.maximum(h, 0.0)
    h = bn(conv(h, w2), g2, b2)
    n, c, hh, ww = h.shape
    h = h.reshape(n, c, hh // 2, 2, ww // 2, 2).max(axis=(3, 5))
    return jnp.maximum(h, 0.0)


# ----------------------------------- main -----------------------------------

if __name__ == "__main__":
    N, CIN, COUT, H, W = 2, 4, 8, 16, 16
    keys = jax.random.split(jax.random.PRNGKey(0), 7)

    x = jax.random.normal(keys[0], (N, CIN, H, W), jnp.float32)
    w1 = 0.2 * jax.random.normal(keys[1], (CIN, CIN, 3, 3), jnp.float32)
    w2 = 0.2 * jax.random.normal(keys[2], (COUT, CIN, 3, 3), jnp.float32)
    g1 = 1.0 + 0.1 * jax.random.normal(keys[3], (CIN,), jnp.float32)
    b1 = 0.1 * jax.random.normal(keys[4], (CIN,), jnp.float32)
    g2 = 1.0 + 0.1 * jax.random.normal(keys[5], (COUT,), jnp.float32)
    b2 = 0.1 * jax.random.normal(keys[6], (COUT,), jnp.float32)

    ref = jax.block_until_ready(_reference(x, w1, g1, b1, w2, g2, b2))

    # Exactness check: f32 MXU operands.
    out_f32 = jax.block_until_ready(
        block_forward(x, w1, g1, b1, w2, g2, b2, mxu_dtype=jnp.float32))
    assert out_f32.shape == (N, COUT, H // 2, W // 2), out_f32.shape
    err = float(jnp.max(jnp.abs(out_f32 - ref)))
    assert err < 5e-3, f"f32 mismatch vs reference, max abs err = {err}"

    # Default path: bf16 MXU operands, f32 accumulation / element-wise math.
    out_bf16 = jax.block_until_ready(block_forward(x, w1, g1, b1, w2, g2, b2))
    err_bf16 = float(jnp.max(jnp.abs(out_bf16 - ref)))
    assert err_bf16 < 1e-1, f"bf16-MXU mismatch vs reference, max abs err = {err_bf16}"

    print("KERNEL_OK")
</pallas_src>

<mosaic_0001>
module attributes {stable_mosaic.version = 11 : i64} {
  func.func @_block_kernel(%arg0: i32, %arg1: memref<8x512xf32, #tpu.memory_space<vmem>>, %arg2: memref<8x512xf32, #tpu.memory_space<vmem>>, %arg3: memref<8x72xf32, #tpu.memory_space<vmem>>, %arg4: memref<8x1xf32, #tpu.memory_space<vmem>>, %arg5: memref<8x1xf32, #tpu.memory_space<vmem>>, %arg6: memref<8x72xf32, #tpu.memory_space<vmem>>, %arg7: memref<8x1xf32, #tpu.memory_space<vmem>>, %arg8: memref<8x1xf32, #tpu.memory_space<vmem>>, %arg9: memref<8x512xf32, #tpu.memory_space<vmem>>) attributes {dimension_semantics = [#tpu.dimension_semantics<arbitrary>], iteration_bounds = array<i64: 1>, scalar_prefetch = 0 : i64, scratch_operands = 0 : i64, tpu.core_type = #tpu.core_type<tc>, window_params = [{pipeline_mode = #tpu.pipeline_mode<synchronous>, transform_indices = @transform_0, window_bounds = array<i64: 8, 512>}, {pipeline_mode = #tpu.pipeline_mode<synchronous>, transform_indices = @transform_1, window_bounds = array<i64: 8, 512>}, {pipeline_mode = #tpu.pipeline_mode<synchronous>, transform_indices = @transform_2, window_bounds = array<i64: 8, 72>}, {pipeline_mode = #tpu.pipeline_mode<synchronous>, transform_indices = @transform_3, window_bounds = array<i64: 8, 1>}, {pipeline_mode = #tpu.pipeline_mode<synchronous>, transform_indices = @transform_4, window_bounds = array<i64: 8, 1>}, {pipeline_mode = #tpu.pipeline_mode<synchronous>, transform_indices = @transform_5, window_bounds = array<i64: 8, 72>}, {pipeline_mode = #tpu.pipeline_mode<synchronous>, transform_indices = @transform_6, window_bounds = array<i64: 8, 1>}, {pipeline_mode = #tpu.pipeline_mode<synchronous>, transform_indices = @transform_7, window_bounds = array<i64: 8, 1>}, {pipeline_mode = #tpu.pipeline_mode<synchronous>, transform_indices = @transform_8, window_bounds = array<i64: 8, 512>}]} {
    %c0 = arith.constant 0 : index
    %c0_0 = arith.constant 0 : index
    %0 = vector.load %arg1[%c0, %c0_0] : memref<8x512xf32, #tpu.memory_space<vmem>>, vector<8x512xf32>
    %c0_1 = arith.constant 0 : index
    %c0_2 = arith.constant 0 : index
    %1 = vector.load %arg2[%c0_1, %c0_2] : memref<8x512xf32, #tpu.memory_space<vmem>>, vector<8x512xf32>
    %c17_i32 = arith.constant 17 : i32
    %2 = tpu.dynamic_rotate %0 by %c17_i32 dim 1 : vector<8x512xf32>, i32 -> vector<8x512xf32>
    %3 = vector.extract_strided_slice %1 {offsets = [0, 0], sizes = [1, 512], strides = [1, 1]} : vector<8x512xf32> to vector<1x512xf32>
    %4 = vector.broadcast %3 : vector<1x512xf32> to vector<8x512xf32>
    %5 = arith.mulf %2, %4 : vector<8x512xf32>
    %c16_i32 = arith.constant 16 : i32
    %6 = tpu.dynamic_rotate %0 by %c16_i32 dim 1 : vector<8x512xf32>, i32 -> vector<8x512xf32>
    %7 = vector.extract_strided_slice %1 {offsets = [1, 0], sizes = [1, 512], strides = [1, 1]} : vector<8x512xf32> to vector<1x512xf32>
    %8 = vector.broadcast %7 : vector<1x512xf32> to vector<8x512xf32>
    %9 = arith.mulf %6, %8 : vector<8x512xf32>
    %c15_i32 = arith.constant 15 : i32
    %10 = tpu.dynamic_rotate %0 by %c15_i32 dim 1 : vector<8x512xf32>, i32 -> vector<8x512xf32>
    %11 = vector.extract_strided_slice %1 {offsets = [2, 0], sizes = [1, 512], strides = [1, 1]} : vector<8x512xf32> to vector<1x512xf32>
    %12 = vector.broadcast %11 : vector<1x512xf32> to vector<8x512xf32>
    %13 = arith.mulf %10, %12 : vector<8x512xf32>
    %c1_i32 = arith.constant 1 : i32
    %14 = tpu.dynamic_rotate %0 by %c1_i32 dim 1 : vector<8x512xf32>, i32 -> vector<8x512xf32>
    %15 = vector.extract_strided_slice %1 {offsets = [3, 0], sizes = [1, 512], strides = [1, 1]} : vector<8x512xf32> to vector<1x512xf32>
    %16 = vector.broadcast %15 : vector<1x512xf32> to vector<8x512xf32>
    %17 = arith.mulf %14, %16 : vector<8x512xf32>
    %c511_i32 = arith.constant 511 : i32
    %18 = tpu.dynamic_rotate %0 by %c511_i32 dim 1 : vector<8x512xf32>, i32 -> vector<8x512xf32>
    %19 = vector.extract_strided_slice %1 {offsets = [4, 0], sizes = [1, 512], strides = [1, 1]} : vector<8x512xf32> to vector<1x512xf32>
    %20 = vector.broadcast %19 : vector<1x512xf32> to vector<8x512xf32>
    %21 = arith.mulf %18, %20 : vector<8x512xf32>
    %c497_i32 = arith.constant 497 : i32
    %22 = tpu.dynamic_rotate %0 by %c497_i32 dim 1 : vector<8x512xf32>, i32 -> vector<8x512xf32>
    %23 = vector.extract_strided_slice %1 {offsets = [5, 0], sizes = [1, 512], strides = [1, 1]} : vector<8x512xf32> to vector<1x512xf32>
    %24 = vector.broadcast %23 : vector<1x512xf32> to vector<8x512xf32>
    %25 = arith.mulf %22, %24 : vector<8x512xf32>
    %c496_i32 = arith.constant 496 : i32
    %26 = tpu.dynamic_rotate %0 by %c496_i32 dim 1 : vector<8x512xf32>, i32 -> vector<8x512xf32>
    %27 = vector.extract_strided_slice %1 {offsets = [6, 0], sizes = [1, 512], strides = [1, 1]} : vector<8x512xf32> to vector<1x512xf32>
    %28 = vector.broadcast %27 : vector<1x512xf32> to vector<8x512xf32>
    %29 = arith.mulf %26, %28 : vector<8x512xf32>
    %c495_i32 = arith.constant 495 : i32
    %30 = tpu.dynamic_rotate %0 by %c495_i32 dim 1 : vector<8x512xf32>, i32 -> vector<8x512xf32>
    %31 = vector.extract_strided_slice %1 {offsets = [7, 0], sizes = [1, 512], strides = [1, 1]} : vector<8x512xf32> to vector<1x512xf32>
    %32 = vector.broadcast %31 : vector<1x512xf32> to vector<8x512xf32>
    %33 = arith.mulf %30, %32 : vector<8x512xf32>
    %34 = tpu.concatenate %5, %9, %13, %17, %0, %21, %25, %29, %33 in 0 : vector<8x512xf32>, vector<8x512xf32>, vector<8x512xf32>, vector<8x512xf32>, vector<8x512xf32>, vector<8x512xf32>, vector<8x512xf32>, vector<8x512xf32>, vector<8x512xf32> -> vector<72x512xf32>
    %c0_3 = arith.constant 0 : index
    %c0_4 = arith.constant 0 : index
    %35 = vector.load %arg3[%c0_3, %c0_4] : memref<8x72xf32, #tpu.memory_space<vmem>>, vector<8x72xf32>
    %cst = arith.constant dense<0.000000e+00> : vector<8x512xf32>
    %36 = tpu.matmul %35, %34, %cst {dimension_numbers = #tpu.dot_dimension_numbers<[1], [0], [0], [1], [0, 0, 1, 1], [], []>} : vector<8x72xf32>, vector<72x512xf32>, vector<8x512xf32> -> vector<8x512xf32>
    %cst_5 = arith.constant dense<0.000000e+00> : vector<8xf32>
    %37 = vector.multi_reduction <add>, %36, %cst_5 [1] : vector<8x512xf32> to vector<8xf32>
    %38 = vector.shape_cast %37 : vector<8xf32> to vector<8x1xf32>
    %cst_6 = arith.constant 5.120000e+02 : f32
    %39 = vector.broadcast %cst_6 : f32 to vector<8x1xf32>
    %40 = arith.divf %38, %39 : vector<8x1xf32>
    %41 = vector.broadcast %40 : vector<8x1xf32> to vector<8x512xf32>
    %42 = arith.subf %36, %41 : vector<8x512xf32>
    %43 = arith.mulf %42, %42 : vector<8x512xf32>
    %cst_7 = arith.constant dense<0.000000e+00> : vector<8xf32>
    %44 = vector.multi_reduction <add>, %43, %cst_7 [1] : vector<8x512xf32> to vector<8xf32>
    %45 = vector.shape_cast %44 : vector<8xf32> to vector<8x1xf32>
    %cst_8 = arith.constant 5.120000e+02 : f32
    %46 = vector.broadcast %cst_8 : f32 to vector<8x1xf32>
    %47 = arith.divf %45, %46 : vector<8x1xf32>
    %48 = vector.broadcast %40 : vector<8x1xf32> to vector<8x512xf32>
    %49 = arith.subf %36, %48 : vector<8x512xf32>
    %cst_9 = arith.constant 9.99999974E-6 : f32
    %50 = vector.broadcast %cst_9 : f32 to vector<8x1xf32>
    %51 = arith.addf %47, %50 : vector<8x1xf32>
    %52 = math.rsqrt %51 : vector<8x1xf32>
    %53 = vector.broadcast %52 : vector<8x1xf32> to vector<8x512xf32>
    %54 = arith.mulf %49, %53 : vector<8x512xf32>
    %c0_10 = arith.constant 0 : index
    %c0_11 = arith.constant 0 : index
    %55 = vector.load %arg4[%c0_10, %c0_11] : memref<8x1xf32, #tpu.memory_space<vmem>>, vector<8x1xf32>
    %56 = vector.broadcast %55 : vector<8x1xf32> to vector<8x512xf32>
    %57 = arith.mulf %54, %56 : vector<8x512xf32>
    %c0_12 = arith.constant 0 : index
    %c0_13 = arith.constant 0 : index
    %58 = vector.load %arg5[%c0_12, %c0_13] : memref<8x1xf32, #tpu.memory_space<vmem>>, vector<8x1xf32>
    %59 = vector.broadcast %58 : vector<8x1xf32> to vector<8x512xf32>
    %60 = arith.addf %57, %59 : vector<8x512xf32>
    %61 = arith.addf %0, %60 : vector<8x512xf32>
    %cst_14 = arith.constant 0.000000e+00 : f32
    %62 = vector.broadcast %cst_14 : f32 to vector<8x512xf32>
    %63 = arith.maximumf %61, %62 : vector<8x512xf32>
    %c17_i32_15 = arith.constant 17 : i32
    %64 = tpu.dynamic_rotate %63 by %c17_i32_15 dim 1 : vector<8x512xf32>, i32 -> vector<8x512xf32>
    %65 = vector.extract_strided_slice %1 {offsets = [0, 0], sizes = [1, 512], strides = [1, 1]} : vector<8x512xf32> to vector<1x512xf32>
    %66 = vector.broadcast %65 : vector<1x512xf32> to vector<8x512xf32>
    %67 = arith.mulf %64, %66 : vector<8x512xf32>
    %c16_i32_16 = arith.constant 16 : i32
    %68 = tpu.dynamic_rotate %63 by %c16_i32_16 dim 1 : vector<8x512xf32>, i32 -> vector<8x512xf32>
    %69 = vector.extract_strided_slice %1 {offsets = [1, 0], sizes = [1, 512], strides = [1, 1]} : vector<8x512xf32> to vector<1x512xf32>
    %70 = vector.broadcast %69 : vector<1x512xf32> to vector<8x512xf32>
    %71 = arith.mulf %68, %70 : vector<8x512xf32>
    %c15_i32_17 = arith.constant 15 : i32
    %72 = tpu.dynamic_rotate %63 by %c15_i32_17 dim 1 : vector<8x512xf32>, i32 -> vector<8x512xf32>
    %73 = vector.extract_strided_slice %1 {offsets = [2, 0], sizes = [1, 512], strides = [1, 1]} : vector<8x512xf32> to vector<1x512xf32>
    %74 = vector.broadcast %73 : vector<1x512xf32> to vector<8x512xf32>
    %75 = arith.mulf %72, %74 : vector<8x512xf32>
    %c1_i32_18 = arith.constant 1 : i32
    %76 = tpu.dynamic_rotate %63 by %c1_i32_18 dim 1 : vector<8x512xf32>, i32 -> vector<8x512xf32>
    %77 = vector.extract_strided_slice %1 {offsets = [3, 0], sizes = [1, 512], strides = [1, 1]} : vector<8x512xf32> to vector<1x512xf32>
    %78 = vector.broadcast %77 : vector<1x512xf32> to vector<8x512xf32>
    %79 = arith.mulf %76, %78 : vector<8x512xf32>
    %c511_i32_19 = arith.constant 511 : i32
    %80 = tpu.dynamic_rotate %63 by %c511_i32_19 dim 1 : vector<8x512xf32>, i32 -> vector<8x512xf32>
    %81 = vector.extract_strided_slice %1 {offsets = [4, 0], sizes = [1, 512], strides = [1, 1]} : vector<8x512xf32> to vector<1x512xf32>
    %82 = vector.broadcast %81 : vector<1x512xf32> to vector<8x512xf32>
    %83 = arith.mulf %80, %82 : vector<8x512xf32>
    %c497_i32_20 = arith.constant 497 : i32
    %84 = tpu.dynamic_rotate %63 by %c497_i32_20 dim 1 : vector<8x512xf32>, i32 -> vector<8x512xf32>
    %85 = vector.extract_strided_slice %1 {offsets = [5, 0], sizes = [1, 512], strides = [1, 1]} : vector<8x512xf32> to vector<1x512xf32>
    %86 = vector.broadcast %85 : vector<1x512xf32> to vector<8x512xf32>
    %87 = arith.mulf %84, %86 : vector<8x512xf32>
    %c496_i32_21 = arith.constant 496 : i32
    %88 = tpu.dynamic_rotate %63 by %c496_i32_21 dim 1 : vector<8x512xf32>, i32 -> vector<8x512xf32>
    %89 = vector.extract_strided_slice %1 {offsets = [6, 0], sizes = [1, 512], strides = [1, 1]} : vector<8x512xf32> to vector<1x512xf32>
    %90 = vector.broadcast %89 : vector<1x512xf32> to vector<8x512xf32>
    %91 = arith.mulf %88, %90 : vector<8x512xf32>
    %c495_i32_22 = arith.constant 495 : i32
    %92 = tpu.dynamic_rotate %63 by %c495_i32_22 dim 1 : vector<8x512xf32>, i32 -> vector<8x512xf32>
    %93 = vector.extract_strided_slice %1 {offsets = [7, 0], sizes = [1, 512], strides = [1, 1]} : vector<8x512xf32> to vector<1x512xf32>
    %94 = vector.broadcast %93 : vector<1x512xf32> to vector<8x512xf32>
    %95 = arith.mulf %92, %94 : vector<8x512xf32>
    %96 = tpu.concatenate %67, %71, %75, %79, %63, %83, %87, %91, %95 in 0 : vector<8x512xf32>, vector<8x512xf32>, vector<8x512xf32>, vector<8x512xf32>, vector<8x512xf32>, vector<8x512xf32>, vector<8x512xf32>, vector<8x512xf32>, vector<8x512xf32> -> vector<72x512xf32>
    %c0_23 = arith.constant 0 : index
    %c0_24 = arith.constant 0 : index
    %97 = vector.load %arg6[%c0_23, %c0_24] : memref<8x72xf32, #tpu.memory_space<vmem>>, vector<8x72xf32>
    %cst_25 = arith.constant dense<0.000000e+00> : vector<8x512xf32>
    %98 = tpu.matmul %97, %96, %cst_25 {dimension_numbers = #tpu.dot_dimension_numbers<[1], [0], [0], [1], [0, 0, 1, 1], [], []>} : vector<8x72xf32>, vector<72x512xf32>, vector<8x512xf32> -> vector<8x512xf32>
    %cst_26 = arith.constant dense<0.000000e+00> : vector<8xf32>
    %99 = vector.multi_reduction <add>, %98, %cst_26 [1] : vector<8x512xf32> to vector<8xf32>
    %100 = vector.shape_cast %99 : vector<8xf32> to vector<8x1xf32>
    %cst_27 = arith.constant 5.120000e+02 : f32
    %101 = vector.broadcast %cst_27 : f32 to vector<8x1xf32>
    %102 = arith.divf %100, %101 : vector<8x1xf32>
    %103 = vector.broadcast %102 : vector<8x1xf32> to vector<8x512xf32>
    %104 = arith.subf %98, %103 : vector<8x512xf32>
    %105 = arith.mulf %104, %104 : vector<8x512xf32>
    %cst_28 = arith.constant dense<0.000000e+00> : vector<8xf32>
    %106 = vector.multi_reduction <add>, %105, %cst_28 [1] : vector<8x512xf32> to vector<8xf32>
    %107 = vector.shape_cast %106 : vector<8xf32> to vector<8x1xf32>
    %cst_29 = arith.constant 5.120000e+02 : f32
    %108 = vector.broadcast %cst_29 : f32 to vector<8x1xf32>
    %109 = arith.divf %107, %108 : vector<8x1xf32>
    %110 = vector.broadcast %102 : vector<8x1xf32> to vector<8x512xf32>
    %111 = arith.subf %98, %110 : vector<8x512xf32>
    %cst_30 = arith.constant 9.99999974E-6 : f32
    %112 = vector.broadcast %cst_30 : f32 to vector<8x1xf32>
    %113 = arith.addf %109, %112 : vector<8x1xf32>
    %114 = math.rsqrt %113 : vector<8x1xf32>
    %115 = vector.broadcast %114 : vector<8x1xf32> to vector<8x512xf32>
    %116 = arith.mulf %111, %115 : vector<8x512xf32>
    %c0_31 = arith.constant 0 : index
    %c0_32 = arith.constant 0 : index
    %117 = vector.load %arg7[%c0_31, %c0_32] : memref<8x1xf32, #tpu.memory_space<vmem>>, vector<8x1xf32>
    %118 = vector.broadcast %117 : vector<8x1xf32> to vector<8x512xf32>
    %119 = arith.mulf %116, %118 : vector<8x512xf32>
    %c0_33 = arith.constant 0 : index
    %c0_34 = arith.constant 0 : index
    %120 = vector.load %arg8[%c0_33, %c0_34] : memref<8x1xf32, #tpu.memory_space<vmem>>, vector<8x1xf32>
    %121 = vector.broadcast %120 : vector<8x1xf32> to vector<8x512xf32>
    %122 = arith.addf %119, %121 : vector<8x512xf32>
    %c511_i32_35 = arith.constant 511 : i32
    %123 = tpu.dynamic_rotate %122 by %c511_i32_35 dim 1 : vector<8x512xf32>, i32 -> vector<8x512xf32>
    %124 = arith.maximumf %122, %123 : vector<8x512xf32>
    %c496_i32_36 = arith.constant 496 : i32
    %125 = tpu.dynamic_rotate %124 by %c496_i32_36 dim 1 : vector<8x512xf32>, i32 -> vector<8x512xf32>
    %126 = arith.maximumf %124, %125 : vector<8x512xf32>
    %cst_37 = arith.constant 0.000000e+00 : f32
    %127 = vector.broadcast %cst_37 : f32 to vector<8x512xf32>
    %128 = arith.maximumf %126, %127 : vector<8x512xf32>
    %c0_38 = arith.constant 0 : index
    %c0_39 = arith.constant 0 : index
    %129 = vector.load %arg9[%c0_38, %c0_39] : memref<8x512xf32, #tpu.memory_space<vmem>>, vector<8x512xf32>
    tpu.vector_store %arg9[%c0_38, %c0_39], %128 {strides = array<i32>} : memref<8x512xf32, #tpu.memory_space<vmem>>, vector<8x512xf32>,
    return
  }
  func.func @transform_0(%arg0: i32) -> (i32, i32) {
    %c0_i32 = arith.constant 0 : i32
    %c0_i32_0 = arith.constant 0 : i32
    %c0_i32_1 = arith.constant 0 : i32
    return %c0_i32, %c0_i32_0 : i32, i32
  }
  func.func @transform_1(%arg0: i32) -> (i32, i32) {
    %c0_i32 = arith.constant 0 : i32
    %c0_i32_0 = arith.constant 0 : i32
    %c0_i32_1 = arith.constant 0 : i32
    return %c0_i32, %c0_i32_0 : i32, i32
  }
  func.func @transform_2(%arg0: i32) -> (i32, i32) {
    %c0_i32 = arith.constant 0 : i32
    %c0_i32_0 = arith.constant 0 : i32
    %c0_i32_1 = arith.constant 0 : i32
    return %c0_i32, %c0_i32_0 : i32, i32
  }
  func.func @transform_3(%arg0: i32) -> (i32, i32) {
    %c0_i32 = arith.constant 0 : i32
    %c0_i32_0 = arith.constant 0 : i32
    %c0_i32_1 = arith.constant 0 : i32
    return %c0_i32, %c0_i32_0 : i32, i32
  }
  func.func @transform_4(%arg0: i32) -> (i32, i32) {
    %c0_i32 = arith.constant 0 : i32
    %c0_i32_0 = arith.constant 0 : i32
    %c0_i32_1 = arith.constant 0 : i32
    return %c0_i32, %c0_i32_0 : i32, i32
  }
  func.func @transform_5(%arg0: i32) -> (i32, i32) {
    %c0_i32 = arith.constant 0 : i32
    %c0_i32_0 = arith.constant 0 : i32
    %c0_i32_1 = arith.constant 0 : i32
    return %c0_i32, %c0_i32_0 : i32, i32
  }
  func.func @transform_6(%arg0: i32) -> (i32, i32) {
    %c0_i32 = arith.constant 0 : i32
    %c0_i32_0 = arith.constant 0 : i32
    %c0_i32_1 = arith.constant 0 : i32
    return %c0_i32, %c0_i32_0 : i32, i32
  }
  func.func @transform_7(%arg0: i32) -> (i32, i32) {
    %c0_i32 = arith.constant 0 : i32
    %c0_i32_0 = arith.constant 0 : i32
    %c0_i32_1 = arith.constant 0 : i32
    return %c0_i32, %c0_i32_0 : i32, i32
  }
  func.func @transform_8(%arg0: i32) -> (i32, i32) {
    %c0_i32 = arith.constant 0 : i32
    %c0_i32_0 = arith.constant 0 : i32
    %c0_i32_1 = arith.constant 0 : i32
    return %c0_i32, %c0_i32_0 : i32, i32
  }
}

</mosaic_0001>

<bundles_post_ra>
// kernel: block_forward.1
= control target key start
LH: loop header
LB: loop body
LE: loop exit
PB: predicated region body
PF: predicated region fallthrough
CT: control target
= control target key end

     0   :  { %s889_s9 = smov 111   ;;  %s890_s12 = smov 112   ;;  %v896_v4 = vmov 0.0   ;;  %v45_v5 = vlaneseq  ;;  %vm304_vm8 = vcmask 588800   ;;  %s1502_s0 = inlined_call_operand.vmem [shape: f32[8,512], index: 0, kind: input, shape index: {}]   ;;  %s1503_s1 = inlined_call_operand.vmem [shape: f32[8,512], index: 1, kind: input, shape index: {}]   ;;  %s1504_s2 = inlined_call_operand.vmem [shape: f32[8,72], index: 2, kind: input, shape index: {}]   ;;  %s1505_s3 = inlined_call_operand.vmem [shape: f32[8,1], index: 3, kind: input, shape index: {}]   ;;  %s1506_s4 = inlined_call_operand.vmem [shape: f32[8,1], index: 4, kind: input, shape index: {}]   ;;  %s1507_s5 = inlined_call_operand.vmem [shape: f32[8,72], index: 5, kind: input, shape index: {}]   ;;  %s1508_s6 = inlined_call_operand.vmem [shape: f32[8,1], index: 6, kind: input, shape index: {}]   ;;  %s1509_s7 = inlined_call_operand.vmem [shape: f32[8,1], index: 7, kind: input, shape index: {}]   ;;  %s1510_s8 = inlined_call_operand.vmem [shape: f32[8,512], index: 8, kind: output, shape index: {}]  }
   0x1   :  { %v947_v0 = vld [vmem:[%s1502_s0 + $0x8] sm:$0xff]  ;;  %v952_v1 = vld [vmem:[%s1502_s0] sm:$0xff]  ;;  %v961_v2 = vld [vmem:[%s1502_s0 + $0x10] sm:$0xff]  ;;  %s891_s13 = smov 113   ;;  %s892_s16 = smov 127   ;;  %372 = vmatprep.mubr.f32.mxu0 %v896_v4  ;;  %443 = vmatprep.mubr.f32.mxu1 %v896_v4 }
   0x2   :  { %272 = vrot.lane.b32.xlu0 %v947_v0, %s889_s9  ;;  %270 = vrot.lane.b32.xlu1 %v952_v1, %s889_s9  ;;  %v978_v3 = vld [vmem:[%s1502_s0 + $0x18] sm:$0xff]  ;;  %s893_s0 = smov 1   ;;  %s894_s17 = smov 15   ;;  %v1030_v6 = vshrl.u32 %v45_v5, 7  ;;  %v1032_v7 = vand.u32 127, %v45_v5  ;;  %v1037_v8 = vld [vmem:[%s1503_s1 + $0x8] sm:$0xff] }
   0x3   :  { %s895_s18 = smov 16   ;;  %s897_s19 = smov 17   ;;  %v1043_v12 = vld [vmem:[%s1503_s1] sm:$0xff]  ;;  %v1080_v32 = vld [vmem:[%s1503_s1 + $0x18] sm:$0xff]  ;;  %v1085_v33 = vld [vmem:[%s1503_s1 + $0x10] sm:$0xff] }
   0x4   :  { %v285_v9 = vsub.s32 7, %v1030_v6  ;;  %vm278_vm0 = vcmp.lt.s32.totalorder %v1032_v7, 111  ;;  %v252_v14 = vsub.s32 6, %v1030_v6  ;;  %vm245_vm1 = vcmp.lt.s32.totalorder %v1032_v7, 112 }
   0x5   :  { %v219_v23 = vsub.s32 5, %v1030_v6  ;;  %vm212_vm2 = vcmp.lt.s32.totalorder %v1032_v7, 113  ;;  %v186_v37 = vsub.s32 4, %v1030_v6  ;;  %vm179_vm3 = vcmp.lt.s32.totalorder %v1032_v7, 127 }
   0x6   :  { %274 = vrot.lane.b32.xlu0 %v961_v2, %s889_s9  ;;  %239 = vrot.lane.b32.xlu1 %v947_v0, %s890_s12  ;;  %v1047_v13 = vrot.slane %v1037_v8, %v285_v9  ;;  %v1051_v15 = vrot.slane %v1043_v12, %v285_v9  ;;  %v1060_v21 = vrot.slane %v1037_v8, %v252_v14  ;;  %v153_v5 = vsub.s32 3, %v1030_v6 }
   0x7   :  { %v1063_v22 = vrot.slane %v1043_v12, %v252_v14  ;;  %v1075_v31 = vrot.slane %v1037_v8, %v219_v23  ;;  %v1092_v39 = vrot.slane %v1043_v12, %v219_v23  ;;  %v1095_v40 = vrot.slane %v1080_v32, %v285_v9 }
   0x8   :  { %v1098_v41 = vrot.slane %v1085_v33, %v285_v9  ;;  %v1110_v49 = vrot.slane %v1037_v8, %v186_v37  ;;  %v1117_v55 = vrot.slane %v1085_v33, %v252_v14  ;;  %v1120_v56 = vrot.slane %v1080_v32, %v252_v14 }
   0x9   :  { %v1123_v57 = vrot.slane %v1043_v12, %v186_v37  ;;  %v1126_v60 = vrot.slane %v1085_v33, %v219_v23  ;;  %v1139_v14 = vrot.slane %v1080_v32, %v219_v23  ;;  %vm146_vm4 = vcmp.lt.s32.totalorder %v1032_v7, 1 }
   0xa   :  { %241 = vrot.lane.b32.xlu0 %v961_v2, %s890_s12  ;;  %237 = vrot.lane.b32.xlu1 %v952_v1, %s890_s12  ;;  %vm113_vm5 = vcmp.lt.s32.totalorder %v1032_v7, 15  ;;  %vm80_vm6 = vcmp.lt.s32.totalorder %v1032_v7, 16  ;;  %vm47_vm7 = vcmp.lt.s32.totalorder %v1032_v7, 17 }
   0xe   :  { %206 = vrot.lane.b32.xlu0 %v947_v0, %s891_s13  ;;  %208 = vrot.lane.b32.xlu1 %v961_v2, %s891_s13 }
  0x12   :  { %276 = vrot.lane.b32.xlu0 %v978_v3, %s889_s9  ;;  %204 = vrot.lane.b32.xlu1 %v952_v1, %s891_s13 }
  0x16   :  { %173 = vrot.lane.b32.xlu0 %v947_v0, %s892_s16  ;;  %175 = vrot.lane.b32.xlu1 %v961_v2, %s892_s16 }
  0x1a   :  { %243 = vrot.lane.b32.xlu0 %v978_v3, %s890_s12  ;;  %171 = vrot.lane.b32.xlu1 %v952_v1, %s892_s16 }
  0x1e   :  { %210 = vrot.lane.b32.xlu0 %v978_v3, %s891_s13  ;;  %138 = vrot.lane.b32.xlu1 %v952_v1, %s893_s0 }
  0x22   :  { %140 = vrot.lane.b32.xlu0 %v947_v0, %s893_s0  ;;  %177 = vrot.lane.b32.xlu1 %v978_v3, %s892_s16 }
  0x26   :  { %144 = vrot.lane.b32.xlu0 %v978_v3, %s893_s0  ;;  %105 = vrot.lane.b32.xlu1 %v952_v1, %s894_s17 }
  0x2a   :  { %107 = vrot.lane.b32.xlu0 %v947_v0, %s894_s17  ;;  %111 = vrot.lane.b32.xlu1 %v978_v3, %s894_s17 }
  0x2e   :  { %72 = vrot.lane.b32.xlu0 %v952_v1, %s895_s18  ;;  %74 = vrot.lane.b32.xlu1 %v947_v0, %s895_s18 }
  0x32   :  { %142 = vrot.lane.b32.xlu0 %v961_v2, %s893_s0  ;;  %78 = vrot.lane.b32.xlu1 %v978_v3, %s895_s18 }
  0x36   :  { %37 = vrot.lane.b32.xlu0 %v952_v1, %s897_s19  ;;  %39 = vrot.lane.b32.xlu1 %v947_v0, %s897_s19 }
  0x3a   :  { %109 = vrot.lane.b32.xlu0 %v961_v2, %s894_s17  ;;  %43 = vrot.lane.b32.xlu1 %v978_v3, %s897_s19 }
  0x3e   :  { %76 = vrot.lane.b32.xlu0 %v961_v2, %s895_s18  ;;  %41 = vrot.lane.b32.xlu1 %v961_v2, %s897_s19 }
  0x74   :  { %v273_v10 = vpop.permute.xlu0 %272  ;;  %v271_v11 = vpop.permute.xlu1 %270 }
  0x75   :  { %v281_v16 = vsel %vm278_vm0, %v271_v11, %v273_v10 }
  0x76   :  { %v299_v24 = vmul.f32 %v1051_v15, %v281_v16 }
  0x78   :  { %v275_v17 = vpop.permute.xlu0 %274  ;;  %v240_v18 = vpop.permute.xlu1 %239 }
  0x79   :  { %v280_v19 = vsel %vm278_vm0, %v273_v10, %v275_v17 }
  0x7a   :  { %v300_v20 = vmul.f32 %v1047_v13, %v280_v19 }
  0x7c   :  { %322 = vmatprep.subr.mxu0 %v300_v20  ;;  %v242_v25 = vpop.permute.xlu0 %241  ;;  %v238_v26 = vpop.permute.xlu1 %237  ;;  %v1147_v20 = vrot.slane %v1037_v8, %v153_v5 }
  0x7d   :  { %v247_v27 = vsel %vm245_vm1, %v240_v18, %v242_v25  ;;  %v248_v28 = vsel %vm245_vm1, %v238_v26, %v240_v18  ;;  %323 = vmatpush1.msra.mxu0 %v299_v24 }
  0x7e   :  { %v267_v29 = vmul.f32 %v1060_v21, %v247_v27  ;;  %v266_v30 = vmul.f32 %v1063_v22, %v248_v28 }
  0x80   :  { %v207_v34 = vpop.permute.xlu0 %206  ;;  %324 = vmatprep.subr.mxu0 %v267_v29  ;;  %v209_v35 = vpop.permute.xlu1 %208 }
  0x81   :  { %v214_v36 = vsel %vm212_vm2, %v207_v34, %v209_v35  ;;  %325 = vmatpush1.msra.mxu0 %v266_v30 }
  0x82   :  { %v234_v38 = vmul.f32 %v1075_v31, %v214_v36 }
  0x84   :  { %v277_v42 = vpop.permute.xlu0 %276  ;;  %326 = vmatprep.subr.mxu0 %v234_v38  ;;  %v205_v43 = vpop.permute.xlu1 %204 }
  0x85   :  { %v279_v44 = vsel %vm278_vm0, %v275_v17, %v277_v42  ;;  %v215_v45 = vsel %vm212_vm2, %v205_v43, %v207_v34  ;;  %v282_v46 = vsel %vm278_vm0, %v277_v42, %v271_v11  ;;  %v120_v42 = vsub.s32 2, %v1030_v6 }
  0x86   :  { %v233_v47 = vmul.f32 %v1092_v39, %v215_v45  ;;  %v302_v48 = vmul.f32 %v1095_v40, %v282_v46  ;;  %v301_v50 = vmul.f32 %v1098_v41, %v279_v44 }
  0x88   :  { %v174_v51 = vpop.permute.xlu0 %173  ;;  %327 = vmatpush1.msra.mxu0 %v233_v47  ;;  %393 = vmatprep.subr.mxu1 %v302_v48  ;;  %v176_v52 = vpop.permute.xlu1 %175  ;;  %v1177_v47 = vrot.slane %v1037_v8, %v120_v42  ;;  %v1180_v48 = vrot.slane %v1043_v12, %v120_v42 }
  0x89   :  { %v181_v53 = vsel %vm179_vm3, %v174_v51, %v176_v52  ;;  %394 = vmatpush1.msra.mxu1 %v301_v50  ;;  %v87_v50 = vsub.s32 1, %v1030_v6 }
  0x8a   :  { %v201_v54 = vmul.f32 %v1110_v49, %v181_v53 }
  0x8c   :  { %v244_v58 = vpop.permute.xlu0 %243  ;;  %328 = vmatprep.subr.mxu0 %v201_v54  ;;  %v172_v59 = vpop.permute.xlu1 %171 }
  0x8d   :  { %v246_v61 = vsel %vm245_vm1, %v242_v25, %v244_v58  ;;  %v249_v62 = vsel %vm245_vm1, %v244_v58, %v238_v26  ;;  %v182_v63 = vsel %vm179_vm3, %v172_v59, %v174_v51  ;;  %v1153_v25 = vrot.slane %v1085_v33, %v186_v37 }
  0x8e   :  { %v268_v9 = vmul.f32 %v1117_v55, %v246_v61  ;;  %v269_v10 = vmul.f32 %v1120_v56, %v249_v62  ;;  %v200_v11 = vmul.f32 %v1123_v57, %v182_v63  ;;  %v1156_v26 = vrot.slane %v1080_v32, %v186_v37 }
  0x8f   :  { %v1193_v61 = vrot.slane %v1037_v8, %v87_v50 }
  0x90   :  { %v211_v16 = vpop.permute.xlu0 %210  ;;  %329 = vmatpush1.msra.mxu0 %v200_v11  ;;  %395 = vmatprep.subr.mxu1 %v269_v10  ;;  %v139_v17 = vpop.permute.xlu1 %138  ;;  %v1198_v10 = vrot.slane %v1085_v33, %v153_v5 }
  0x91   :  { %v213_v18 = vsel %vm212_vm2, %v209_v35, %v211_v16  ;;  %v216_v19 = vsel %vm212_vm2, %v211_v16, %v205_v43  ;;  %396 = vmatpush1.msra.mxu1 %v268_v9  ;;  %330 = vmatprep.subr.mxu0 %v947_v0  ;;  %v1166_v35 = vrot.slane %v1043_v12, %v153_v5 }
  0x92   :  { %v235_v23 = vmul.f32 %v1126_v60, %v213_v18  ;;  %v236_v24 = vmul.f32 %v1139_v14, %v216_v19  ;;  %331 = vmatpush1.msra.mxu0 %v952_v1  ;;  %v1202_v16 = vrot.slane %v1080_v32, %v153_v5  ;;  %v54_v18 = vsub.s32 0, %v1030_v6 }
  0x94   :  { %v141_v27 = vpop.permute.xlu0 %140  ;;  %397 = vmatprep.subr.mxu1 %v236_v24  ;;  %v178_v28 = vpop.permute.xlu1 %177 }
  0x95   :  { %v149_v29 = vsel %vm146_vm4, %v139_v17, %v141_v27  ;;  %v180_v30 = vsel %vm179_vm3, %v176_v52, %v178_v28  ;;  %v183_v34 = vsel %vm179_vm3, %v178_v28, %v172_v59  ;;  %398 = vmatpush1.msra.mxu1 %v235_v23 }
  0x96   :  { %v168_v36 = vmul.f32 %v1147_v20, %v149_v29  ;;  %v202_v37 = vmul.f32 %v1153_v25, %v180_v30  ;;  %v203_v38 = vmul.f32 %v1156_v26, %v183_v34  ;;  %v1219_v34 = vrot.slane %v1037_v8, %v54_v18 }
  0x98   :  { %v145_v43 = vpop.permute.xlu0 %144  ;;  %332 = vmatprep.subr.mxu0 %v168_v36  ;;  %399 = vmatprep.subr.mxu1 %v203_v38  ;;  %v106_v44 = vpop.permute.xlu1 %105 }
  0x99   :  { %v150_v45 = vsel %vm146_vm4, %v145_v43, %v139_v17  ;;  %400 = vmatpush1.msra.mxu1 %v202_v37  ;;  %v1205_v17 = vrot.slane %v1043_v12, %v87_v50 }
  0x9a   :  { %v167_v46 = vmul.f32 %v1166_v35, %v150_v45  ;;  %401 = vmatprep.subr.mxu1 %v978_v3  ;;  %v1231_v45 = vrot.slane %v1043_v12, %v54_v18 }
  0x9b   :  { %402 = vmatpush1.msra.mxu1 %v961_v2 }
  0x9c   :  { %v108_v51 = vpop.permute.xlu0 %107  ;;  %333 = vmatpush1.msra.mxu0 %v167_v46  ;;  %v112_v52 = vpop.permute.xlu1 %111 }
  0x9d   :  { %v116_v53 = vsel %vm113_vm5, %v106_v44, %v108_v51  ;;  %v117_v54 = vsel %vm113_vm5, %v112_v52, %v106_v44  ;;  %v1228_v44 = vrot.slane %v1080_v32, %v120_v42 }
  0x9e   :  { %v135_v58 = vmul.f32 %v1177_v47, %v116_v53  ;;  %v134_v59 = vmul.f32 %v1180_v48, %v117_v54 }
  0xa0   :  { %v73_v62 = vpop.permute.xlu0 %72  ;;  %334 = vmatprep.subr.mxu0 %v135_v58  ;;  %v75_v63 = vpop.permute.xlu1 %74 }
  0xa1   :  { %v83_v9 = vsel %vm80_vm6, %v73_v62, %v75_v63  ;;  %335 = vmatpush1.msra.mxu0 %v134_v59  ;;  %v1240_v59 = vrot.slane %v1085_v33, %v87_v50 }
  0xa2   :  { %v102_v11 = vmul.f32 %v1193_v61, %v83_v9  ;;  %v1246_v9 = vrot.slane %v1080_v32, %v87_v50  ;;  %v1259_v50 = vrot.slane %v1085_v33, %v54_v18 }
  0xa4   :  { %v143_v19 = vpop.permute.xlu0 %142  ;;  %336 = vmatprep.subr.mxu0 %v102_v11  ;;  %v79_v23 = vpop.permute.xlu1 %78  ;;  %v1252_v11 = vrot.slane %v1080_v32, %v54_v18 }
  0xa5   :  { %v147_v24 = vsel %vm146_vm4, %v143_v19, %v145_v43  ;;  %v148_v28 = vsel %vm146_vm4, %v141_v27, %v143_v19  ;;  %v84_v29 = vsel %vm80_vm6, %v79_v23, %v73_v62  ;;  %v1225_v43 = vrot.slane %v1085_v33, %v120_v42 }
  0xa6   :  { %v169_v5 = vmul.f32 %v1198_v10, %v148_v28  ;;  %v170_v30 = vmul.f32 %v1202_v16, %v147_v24  ;;  %v101_v6 = vmul.f32 %v1205_v17, %v84_v29 }
  0xa8   :  { %v38_v36 = vpop.permute.xlu0 %37  ;;  %337 = vmatpush1.msra.mxu0 %v101_v6  ;;  %403 = vmatprep.subr.mxu1 %v170_v30  ;;  %v40_v37 = vpop.permute.xlu1 %39 }
  0xa9   :  { %v50_v27 = vsel %vm47_vm7, %v38_v36, %v40_v37  ;;  %404 = vmatpush1.msra.mxu1 %v169_v5 }
  0xaa   :  { %v69_v38 = vmul.f32 %v1219_v34, %v50_v27 }
  0xac   :  { %v110_v8 = vpop.permute.xlu0 %109  ;;  %338 = vmatprep.subr.mxu0 %v69_v38  ;;  %v44_v46 = vpop.permute.xlu1 %43 }
  0xad   :  { %v114_v53 = vsel %vm113_vm5, %v110_v8, %v112_v52  ;;  %v115_v54 = vsel %vm113_vm5, %v108_v51, %v110_v8  ;;  %v51_v58 = vsel %vm47_vm7, %v44_v46, %v38_v36  ;;  %v303_v52 = vld [vmem:[%s1504_s2] sm:$0xff]  ;;  %v898_v8 = vmov 0  }
  0xae   :  { %v136_v42 = vmul.f32 %v1225_v43, %v115_v54  ;;  %v137_v12 = vmul.f32 %v1228_v44, %v114_v53  ;;  %v68_v62 = vmul.f32 %v1231_v45, %v51_v58  ;;  %883 = vset.pattern.permute.xlu0 %v898_v8  ;;  %884 = vset.pattern.permute.xlu1 %v898_v8 }
  0xb0   :  { %v77_v51 = vpop.permute.xlu0 %76  ;;  %339 = vmatpush1.msra.mxu0 %v68_v62  ;;  %405 = vmatprep.subr.mxu1 %v137_v12  ;;  %v42_v19 = vpop.permute.xlu1 %41 }
  0xb1   :  { %v81_v24 = vsel %vm80_vm6, %v77_v51, %v79_v23  ;;  %v82_v28 = vsel %vm80_vm6, %v75_v63, %v77_v51  ;;  %v48_v29 = vsel %vm47_vm7, %v42_v19, %v44_v46  ;;  %406 = vmatpush1.msra.mxu1 %v136_v42  ;;  %v49_v32 = vsel %vm47_vm7, %v40_v37, %v42_v19  ;;  %v477_v46 = vld [vmem:[%s1505_s3] sm:$0xff] }
  0xb2   :  { %v103_v5 = vmul.f32 %v1240_v59, %v82_v28  ;;  %v104_v30 = vmul.f32 %v1246_v9, %v81_v24  ;;  %869 = vmatmul.mubr.msk.f32.vlgmr.msra.gmra.mxu0 %vm304_vm8, %v303_v52  ;;  %v71_v63 = vmul.f32 %v1252_v11, %v48_v29  ;;  %v70_v33 = vmul.f32 %v1259_v50, %v49_v32 }
  0xb3   :  { %701 = vmatprep.mubr.f32.mxu0 %v896_v4 }
  0xb4   :  { %407 = vmatprep.subr.mxu1 %v104_v30 }
  0xb5   :  { %408 = vmatpush1.msra.mxu1 %v103_v5  ;;  %v487_v5 = vld [vmem:[%s1506_s4] sm:$0xff] }
  0xb6   :  { %409 = vmatprep.subr.mxu1 %v71_v63 }
  0xb7   :  { %410 = vmatpush1.msra.mxu1 %v70_v33 }
  0xb8   :  { %870 = vmatmul.mubr.msk.f32.vlgmr.msra.gmra.mxu1 %vm304_vm8, %v303_v52 }
  0xb9   :  { %772 = vmatprep.mubr.f32.mxu1 %v896_v4 }
 0x172   :  { %v374_v18 = vpop.f32.mrf.mxu0 }
 0x174   :  { %v376_v23 = vpop.f32.mrf.mxu0 }
 0x175   :  { %v450_v6 = vadd.f32 %v376_v23, %v374_v18 }
 0x178   :  { %v445_v36 = vpop.f32.mrf.mxu1 }
 0x179   :  { %v451_v37 = vadd.f32 %v450_v6, %v445_v36 }
 0x17a   :  { %v447_v27 = vpop.f32.mrf.mxu1 }
 0x17b   :  { %v452_v38 = vadd.f32 %v451_v37, %v447_v27 }
 0x17d   :  { %453 = vadd.xlane.f32.xlu0 %v452_v38 }
 0x193   :  { %480 = vperm.xlu0 %883, %v477_v46  }
 0x206   :  { %v454_v53 = vpop.xlane.xlu0 %453 }
 0x207   :  { %v456_v54 = vmul.f32 0.001953125, %v454_v53 }
 0x209   :  { %v457_v58 = vsub.f32 %v374_v18, %v456_v54  ;;  %v458_v4 = vsub.f32 %v376_v23, %v456_v54  ;;  %v459_v42 = vsub.f32 %v445_v36, %v456_v54  ;;  %v460_v12 = vsub.f32 %v447_v27, %v456_v54 }
 0x20b   :  { %v461_v62 = vmul.f32 %v457_v58, %v457_v58  ;;  %v462_v52 = vmul.f32 %v458_v4, %v458_v4  ;;  %v463_v51 = vmul.f32 %v459_v42, %v459_v42  ;;  %v464_v24 = vmul.f32 %v460_v12, %v460_v12 }
 0x20d   :  { %v465_v19 = vadd.f32 %v462_v52, %v461_v62 }
 0x20e   :  { %v481_v18 = vpop.permute.xlu0 %480 }
 0x20f   :  { %v466_v28 = vadd.f32 %v465_v19, %v463_v51 }
 0x211   :  { %v467_v29 = vadd.f32 %v466_v28, %v464_v24 }
 0x213   :  { %468 = vadd.xlane.f32.xlu1 %v467_v29 }
 0x224   :  { %490 = vperm.xlu1 %884, %v487_v5  }
 0x29c   :  { %v469_v30 = vpop.xlane.xlu1 %468 }
 0x29d   :  { %v470_v32 = vmul.f32 0.001953125, %v469_v30 }
 0x29f   :  { %v471_v63 = vadd.f32 1e-05, %v470_v32 }
 0x2a0   :  { %v491_v27 = vpop.permute.xlu1 %490 }
 0x2a1   :  { %885 = vrsqrt.f32 %v471_v63 }
 0x2ae   :  { %v886_v33 = vpop.eup %885 }
 0x2af   :  { %v473_v23 = vmul.f32 %v886_v33, %v457_v58  ;;  %v474_v6 = vmul.f32 %v886_v33, %v458_v4  ;;  %v475_v36 = vmul.f32 %v886_v33, %v459_v42  ;;  %v476_v37 = vmul.f32 %v886_v33, %v460_v12 }
 0x2b1   :  { %v484_v38 = vmul.f32 %v481_v18, %v474_v6  ;;  %v485_v8 = vmul.f32 %v481_v18, %v475_v36  ;;  %v486_v46 = vmul.f32 %v481_v18, %v476_v37  ;;  %v483_v53 = vmul.f32 %v481_v18, %v473_v23 }
 0x2b3   :  { %v494_v54 = vadd.f32 %v491_v27, %v484_v38  ;;  %v495_v62 = vadd.f32 %v491_v27, %v485_v8  ;;  %v496_v52 = vadd.f32 %v491_v27, %v486_v46  ;;  %v493_v19 = vadd.f32 %v491_v27, %v483_v53 }
 0x2b5   :  { %v498_v51 = vadd.f32 %v494_v54, %v947_v0  ;;  %v499_v24 = vadd.f32 %v495_v62, %v961_v2  ;;  %v500_v28 = vadd.f32 %v496_v52, %v978_v3  ;;  %v497_v58 = vadd.f32 %v493_v19, %v952_v1 }
 0x2b7   :  { %v1282_v29 = vmax.f32 %v498_v51, 0.0  ;;  %v1289_v4 = vmax.f32 %v499_v24, 0.0  ;;  %v1291_v42 = vmax.f32 %v500_v28, 0.0  ;;  %v1297_v0 = vmax.f32 %v497_v58, 0.0 }
 0x2b9   :  { %587 = vrot.lane.b32.xlu0 %v1282_v29, %s891_s13  ;;  %619 = vrot.lane.b32.xlu1 %v1282_v29, %s889_s9 }
 0x2bd   :  { %623 = vrot.lane.b32.xlu0 %v1291_v42, %s889_s9  ;;  %621 = vrot.lane.b32.xlu1 %v1289_v4, %s889_s9 }
 0x2c1   :  { %571 = vrot.lane.b32.xlu0 %v1282_v29, %s892_s16  ;;  %617 = vrot.lane.b32.xlu1 %v1297_v0, %s889_s9 }
 0x2c5   :  { %607 = vrot.lane.b32.xlu0 %v1291_v42, %s890_s12  ;;  %603 = vrot.lane.b32.xlu1 %v1282_v29, %s890_s12 }
 0x2c9   :  { %591 = vrot.lane.b32.xlu0 %v1291_v42, %s891_s13  ;;  %605 = vrot.lane.b32.xlu1 %v1289_v4, %s890_s12 }
 0x2cd   :  { %555 = vrot.lane.b32.xlu0 %v1282_v29, %s893_s0  ;;  %601 = vrot.lane.b32.xlu1 %v1297_v0, %s890_s12 }
 0x2d1   :  { %559 = vrot.lane.b32.xlu0 %v1291_v42, %s893_s0  ;;  %589 = vrot.lane.b32.xlu1 %v1289_v4, %s891_s13 }
 0x2d5   :  { %539 = vrot.lane.b32.xlu0 %v1282_v29, %s894_s17  ;;  %585 = vrot.lane.b32.xlu1 %v1297_v0, %s891_s13 }
 0x2d9   :  { %521 = vrot.lane.b32.xlu0 %v1297_v0, %s895_s18  ;;  %573 = vrot.lane.b32.xlu1 %v1289_v4, %s892_s16 }
 0x2dd   :  { %557 = vrot.lane.b32.xlu0 %v1289_v4, %s893_s0  ;;  %569 = vrot.lane.b32.xlu1 %v1297_v0, %s892_s16 }
 0x2e1   :  { %505 = vrot.lane.b32.xlu0 %v1297_v0, %s897_s19  ;;  %553 = vrot.lane.b32.xlu1 %v1297_v0, %s893_s0 }
 0x2e5   :  { %541 = vrot.lane.b32.xlu0 %v1289_v4, %s894_s17  ;;  %575 = vrot.lane.b32.xlu1 %v1291_v42, %s892_s16 }
 0x2e9   :  { %525 = vrot.lane.b32.xlu0 %v1289_v4, %s895_s18  ;;  %537 = vrot.lane.b32.xlu1 %v1297_v0, %s894_s17 }
 0x2ed   :  { %543 = vrot.lane.b32.xlu1 %v1291_v42, %s894_s17 }
 0x2f1   :  { %523 = vrot.lane.b32.xlu1 %v1282_v29, %s895_s18 }
 0x2f5   :  { %527 = vrot.lane.b32.xlu1 %v1291_v42, %s895_s18 }
 0x2f9   :  { %507 = vrot.lane.b32.xlu1 %v1282_v29, %s897_s19 }
 0x2fd   :  { %511 = vrot.lane.b32.xlu1 %v1291_v42, %s897_s19 }
 0x301   :  { %509 = vrot.lane.b32.xlu1 %v1289_v4, %s897_s19 }
 0x32b   :  { %v588_v1 = vpop.permute.xlu0 %587  ;;  %v620_v2 = vpop.permute.xlu1 %619 }
 0x32f   :  { %v624_v3 = vpop.permute.xlu0 %623  ;;  %v622_v12 = vpop.permute.xlu1 %621 }
 0x330   :  { %v626_v5 = vsel %vm278_vm0, %v620_v2, %v622_v12  ;;  %v625_v32 = vsel %vm278_vm0, %v622_v12, %v624_v3 }
 0x331   :  { %v630_v30 = vmul.f32 %v626_v5, %v1047_v13  ;;  %v631_v37 = vmul.f32 %v625_v32, %v1098_v41 }
 0x333   :  { %v572_v63 = vpop.permute.xlu0 %571  ;;  %651 = vmatprep.subr.mxu0 %v630_v30  ;;  %v618_v33 = vpop.permute.xlu1 %617 }
 0x334   :  { %v627_v18 = vsel %vm278_vm0, %v618_v33, %v620_v2  ;;  %v628_v23 = vsel %vm278_vm0, %v624_v3, %v618_v33 }
 0x335   :  { %v629_v6 = vmul.f32 %v627_v18, %v1051_v15  ;;  %v632_v36 = vmul.f32 %v628_v23, %v1095_v40 }
 0x337   :  { %v608_v27 = vpop.permute.xlu0 %607  ;;  %652 = vmatpush1.msra.mxu0 %v629_v6  ;;  %722 = vmatprep.subr.mxu1 %v632_v36  ;;  %v604_v13 = vpop.permute.xlu1 %603 }
 0x338   :  { %723 = vmatpush1.msra.mxu1 %v631_v37 }
 0x33b   :  { %v592_v38 = vpop.permute.xlu0 %591  ;;  %v606_v8 = vpop.permute.xlu1 %605 }
 0x33c   :  { %v610_v46 = vsel %vm245_vm1, %v604_v13, %v606_v8  ;;  %v609_v54 = vsel %vm245_vm1, %v606_v8, %v608_v27 }
 0x33d   :  { %v614_v53 = vmul.f32 %v610_v46, %v1060_v21  ;;  %v615_v19 = vmul.f32 %v609_v54, %v1117_v55 }
 0x33f   :  { %v556_v15 = vpop.permute.xlu0 %555  ;;  %653 = vmatprep.subr.mxu0 %v614_v53  ;;  %v602_v40 = vpop.permute.xlu1 %601 }
 0x340   :  { %v611_v41 = vsel %vm245_vm1, %v602_v40, %v604_v13  ;;  %v612_v62 = vsel %vm245_vm1, %v608_v27, %v602_v40 }
 0x341   :  { %v613_v52 = vmul.f32 %v611_v41, %v1063_v22  ;;  %v616_v51 = vmul.f32 %v612_v62, %v1120_v56 }
 0x343   :  { %v560_v24 = vpop.permute.xlu0 %559  ;;  %654 = vmatpush1.msra.mxu0 %v613_v52  ;;  %724 = vmatprep.subr.mxu1 %v616_v51  ;;  %v590_v21 = vpop.permute.xlu1 %589 }
 0x344   :  { %v594_v28 = vsel %vm212_vm2, %v588_v1, %v590_v21  ;;  %725 = vmatpush1.msra.mxu1 %v615_v19  ;;  %v593_v2 = vsel %vm212_vm2, %v590_v21, %v592_v38 }
 0x345   :  { %v598_v58 = vmul.f32 %v594_v28, %v1075_v31  ;;  %v599_v30 = vmul.f32 %v593_v2, %v1126_v60 }
 0x347   :  { %v540_v3 = vpop.permute.xlu0 %539  ;;  %655 = vmatprep.subr.mxu0 %v598_v58  ;;  %v586_v22 = vpop.permute.xlu1 %585 }
 0x348   :  { %v595_v56 = vsel %vm212_vm2, %v586_v22, %v588_v1  ;;  %v596_v55 = vsel %vm212_vm2, %v592_v38, %v586_v22 }
 0x349   :  { %v597_v12 = vmul.f32 %v595_v56, %v1092_v39  ;;  %v600_v5 = vmul.f32 %v596_v55, %v1139_v14 }
 0x34b   :  { %v522_v32 = vpop.permute.xlu0 %521  ;;  %656 = vmatpush1.msra.mxu0 %v597_v12  ;;  %726 = vmatprep.subr.mxu1 %v600_v5  ;;  %v574_v31 = vpop.permute.xlu1 %573 }
 0x34c   :  { %v578_v33 = vsel %vm179_vm3, %v572_v63, %v574_v31  ;;  %727 = vmatpush1.msra.mxu1 %v599_v30 }
 0x34d   :  { %v582_v18 = vmul.f32 %v578_v33, %v1110_v49 }
 0x34f   :  { %657 = vmatprep.subr.mxu0 %v582_v18  ;;  %v570_v1 = vpop.permute.xlu1 %569  ;;  %v558_v23 = vpop.permute.xlu0 %557  ;;  %v805_v18 = vld [vmem:[%s1508_s6] sm:$0xff] }
 0x350   :  { %v579_v39 = vsel %vm179_vm3, %v570_v1, %v572_v63 }
 0x351   :  { %v581_v14 = vmul.f32 %v579_v39, %v1123_v57 }
 0x353   :  { %658 = vmatpush1.msra.mxu0 %v581_v14  ;;  %v554_v60 = vpop.permute.xlu1 %553  ;;  %v506_v27 = vpop.permute.xlu0 %505 }
 0x354   :  { %v563_v6 = vsel %vm146_vm4, %v554_v60, %v556_v15  ;;  %v564_v36 = vsel %vm146_vm4, %v560_v24, %v554_v60  ;;  %659 = vmatprep.subr.mxu0 %v1282_v29 }
 0x355   :  { %v565_v49 = vmul.f32 %v564_v36, %v1166_v35  ;;  %v566_v37 = vmul.f32 %v563_v6, %v1147_v20  ;;  %660 = vmatpush1.msra.mxu0 %v1297_v0  ;;  %v561_v35 = vsel %vm146_vm4, %v558_v23, %v560_v24  ;;  %v562_v20 = vsel %vm146_vm4, %v556_v15, %v558_v23 }
 0x356   :  { %v568_v53 = vmul.f32 %v561_v35, %v1202_v16 }
 0x357   :  { %661 = vmatprep.subr.mxu0 %v566_v37  ;;  %v576_v63 = vpop.permute.xlu1 %575  ;;  %v542_v8 = vpop.permute.xlu0 %541 }
 0x358   :  { %v577_v57 = vsel %vm179_vm3, %v574_v31, %v576_v63  ;;  %v580_v13 = vsel %vm179_vm3, %v576_v63, %v570_v1  ;;  %662 = vmatpush1.msra.mxu0 %v565_v49 }
 0x359   :  { %v583_v38 = vmul.f32 %v577_v57, %v1153_v25  ;;  %v584_v29 = vmul.f32 %v580_v13, %v1156_v26  ;;  %v567_v25 = vmul.f32 %v562_v20, %v1198_v10  ;;  %v546_v26 = vsel %vm113_vm5, %v540_v3, %v542_v8  ;;  %v815_v57 = vld [vmem:[%s1509_s7] sm:$0xff] }
 0x35a   :  { %v551_v10 = vmul.f32 %v546_v26, %v1225_v43 }
 0x35b   :  { %728 = vmatprep.subr.mxu1 %v584_v29  ;;  %v538_v0 = vpop.permute.xlu1 %537  ;;  %v526_v52 = vpop.permute.xlu0 %525 }
 0x35c   :  { %v547_v46 = vsel %vm113_vm5, %v538_v0, %v540_v3  ;;  %729 = vmatpush1.msra.mxu1 %v583_v38 }
 0x35d   :  { %v550_v54 = vmul.f32 %v547_v46, %v1177_v47  ;;  %730 = vmatprep.subr.mxu1 %v1291_v42 }
 0x35e   :  { %731 = vmatpush1.msra.mxu1 %v1289_v4 }
 0x35f   :  { %663 = vmatprep.subr.mxu0 %v550_v54  ;;  %732 = vmatprep.subr.mxu1 %v568_v53  ;;  %v544_v15 = vpop.permute.xlu1 %543 }
 0x360   :  { %v545_v40 = vsel %vm113_vm5, %v542_v8, %v544_v15  ;;  %v548_v16 = vsel %vm113_vm5, %v544_v15, %v538_v0  ;;  %733 = vmatpush1.msra.mxu1 %v567_v25 }
 0x361   :  { %v549_v47 = vmul.f32 %v548_v16, %v1180_v48  ;;  %v552_v42 = vmul.f32 %v545_v40, %v1228_v44 }
 0x363   :  { %664 = vmatpush1.msra.mxu0 %v549_v47  ;;  %734 = vmatprep.subr.mxu1 %v552_v42  ;;  %v524_v4 = vpop.permute.xlu1 %523 }
 0x364   :  { %v531_v41 = vsel %vm80_vm6, %v522_v32, %v524_v4  ;;  %735 = vmatpush1.msra.mxu1 %v551_v10  ;;  %v530_v51 = vsel %vm80_vm6, %v524_v4, %v526_v52 }
 0x365   :  { %v534_v62 = vmul.f32 %v531_v41, %v1193_v61  ;;  %v535_v21 = vmul.f32 %v530_v51, %v1240_v59  ;;  %v633_v59 = vld [vmem:[%s1507_s5] sm:$0xff] }
 0x367   :  { %665 = vmatprep.subr.mxu0 %v534_v62  ;;  %v528_v19 = vpop.permute.xlu1 %527 }
 0x368   :  { %v529_v48 = vsel %vm80_vm6, %v526_v52, %v528_v19  ;;  %v532_v43 = vsel %vm80_vm6, %v528_v19, %v522_v32 }
 0x369   :  { %v533_v44 = vmul.f32 %v532_v43, %v1205_v17  ;;  %v536_v24 = vmul.f32 %v529_v48, %v1246_v9 }
 0x36b   :  { %666 = vmatpush1.msra.mxu0 %v533_v44  ;;  %736 = vmatprep.subr.mxu1 %v536_v24  ;;  %v508_v61 = vpop.permute.xlu1 %507 }
 0x36c   :  { %v515_v28 = vsel %vm47_vm7, %v506_v27, %v508_v61  ;;  %737 = vmatpush1.msra.mxu1 %v535_v21 }
 0x36d   :  { %v518_v58 = vmul.f32 %v515_v28, %v1219_v34 }
 0x36f   :  { %667 = vmatprep.subr.mxu0 %v518_v58  ;;  %v512_v2 = vpop.permute.xlu1 %511 }
 0x370   :  { %v516_v3 = vsel %vm47_vm7, %v512_v2, %v506_v27 }
 0x371   :  { %v517_v17 = vmul.f32 %v516_v3, %v1231_v45 }
 0x373   :  { %668 = vmatpush1.msra.mxu0 %v517_v17  ;;  %v510_v9 = vpop.permute.xlu1 %509 }
 0x374   :  { %v513_v22 = vsel %vm47_vm7, %v510_v9, %v512_v2  ;;  %v514_v56 = vsel %vm47_vm7, %v508_v61, %v510_v9  ;;  %871 = vmatmul.mubr.msk.f32.vlgmr.msra.gmra.mxu0 %vm304_vm8, %v633_v59 }
 0x375   :  { %v519_v34 = vmul.f32 %v514_v56, %v1259_v50  ;;  %v520_v55 = vmul.f32 %v513_v22, %v1252_v11 }
 0x377   :  { %738 = vmatprep.subr.mxu1 %v520_v55 }
 0x378   :  { %739 = vmatpush1.msra.mxu1 %v519_v34 }
 0x379   :  { %872 = vmatmul.mubr.msk.f32.vlgmr.msra.gmra.mxu1 %vm304_vm8, %v633_v59 }
 0x434   :  { %v703_v45 = vpop.f32.mrf.mxu0 }
 0x436   :  { %v705_v12 = vpop.f32.mrf.mxu0 }
 0x437   :  { %v779_v5 = vadd.f32 %v705_v12, %v703_v45 }
 0x439   :  { %v774_v30 = vpop.f32.mrf.mxu1 }
 0x43a   :  { %v780_v32 = vadd.f32 %v779_v5, %v774_v30 }
 0x43b   :  { %v776_v31 = vpop.f32.mrf.mxu1 }
 0x43c   :  { %v781_v33 = vadd.f32 %v780_v32, %v776_v31 }
 0x43e   :  { %782 = vadd.xlane.f32.xlu0 %v781_v33 }
 0x454   :  { %808 = vperm.xlu0 %883, %v805_v18  }
 0x4c7   :  { %v783_v50 = vpop.xlane.xlu0 %782 }
 0x4c8   :  { %v784_v1 = vmul.f32 0.001953125, %v783_v50 }
 0x4ca   :  { %v785_v11 = vsub.f32 %v703_v45, %v784_v1  ;;  %v786_v23 = vsub.f32 %v705_v12, %v784_v1  ;;  %v787_v39 = vsub.f32 %v774_v30, %v784_v1  ;;  %v788_v14 = vsub.f32 %v776_v31, %v784_v1 }
 0x4cc   :  { %v789_v60 = vmul.f32 %v785_v11, %v785_v11  ;;  %v790_v6 = vmul.f32 %v786_v23, %v786_v23  ;;  %v791_v36 = vmul.f32 %v787_v39, %v787_v39  ;;  %v792_v37 = vmul.f32 %v788_v14, %v788_v14 }
 0x4ce   :  { %v793_v49 = vadd.f32 %v790_v6, %v789_v60 }
 0x4cf   :  { %v809_v53 = vpop.permute.xlu0 %808 }
 0x4d0   :  { %v794_v27 = vadd.f32 %v793_v49, %v791_v36 }
 0x4d2   :  { %v795_v63 = vadd.f32 %v794_v27, %v792_v37 }
 0x4d4   :  { %796 = vadd.xlane.f32.xlu1 %v795_v63 }
 0x4e5   :  { %818 = vperm.xlu1 %884, %v815_v57  }
 0x55d   :  { %v797_v13 = vpop.xlane.xlu1 %796 }
 0x55e   :  { %v798_v38 = vmul.f32 0.001953125, %v797_v13 }
 0x560   :  { %v799_v29 = vadd.f32 1e-05, %v798_v38 }
 0x561   :  { %v819_v26 = vpop.permute.xlu1 %818 }
 0x562   :  { %887 = vrsqrt.f32 %v799_v29 }
 0x56f   :  { %v888_v35 = vpop.eup %887 }
 0x570   :  { %v802_v20 = vmul.f32 %v888_v35, %v786_v23  ;;  %v801_v0 = vmul.f32 %v888_v35, %v785_v11  ;;  %v804_v8 = vmul.f32 %v888_v35, %v788_v14  ;;  %v803_v46 = vmul.f32 %v888_v35, %v787_v39 }
 0x572   :  { %v812_v54 = vmul.f32 %v809_v53, %v802_v20  ;;  %v811_v25 = vmul.f32 %v809_v53, %v801_v0  ;;  %v814_v16 = vmul.f32 %v809_v53, %v804_v8  ;;  %v813_v47 = vmul.f32 %v809_v53, %v803_v46 }
 0x574   :  { %v822_v15 = vadd.f32 %v819_v26, %v812_v54  ;;  %v821_v40 = vadd.f32 %v819_v26, %v811_v25  ;;  %v824_v42 = vadd.f32 %v819_v26, %v814_v16  ;;  %v823_v10 = vadd.f32 %v819_v26, %v813_v47 }
 0x576   :  { %827 = vrot.lane.b32.xlu1 %v822_v15, %s892_s16  ;;  %825 = vrot.lane.b32.xlu0 %v821_v40, %s892_s16 }
 0x57a   :  { %831 = vrot.lane.b32.xlu1 %v824_v42, %s892_s16  ;;  %829 = vrot.lane.b32.xlu0 %v823_v10, %s892_s16 }
 0x5e8   :  { %v828_v4 = vpop.permute.xlu1 %827  ;;  %v826_v41 = vpop.permute.xlu0 %825 }
 0x5e9   :  { %v835_v62 = vsel %vm179_vm3, %v826_v41, %v828_v4 }
 0x5ea   :  { %v837_v52 = vmax.f32 %v821_v40, %v835_v62 }
 0x5ec   :  { %v832_v51 = vpop.permute.xlu1 %831  ;;  %841 = vrot.lane.b32.xlu0 %v837_v52, %s890_s12  ;;  %v830_v19 = vpop.permute.xlu0 %829 }
 0x5ed   :  { %v833_v48 = vsel %vm179_vm3, %v830_v19, %v832_v51  ;;  %v834_v43 = vsel %vm179_vm3, %v828_v4, %v830_v19  ;;  %v836_v21 = vsel %vm179_vm3, %v832_v51, %v826_v41 }
 0x5ee   :  { %v838_v44 = vmax.f32 %v822_v15, %v834_v43  ;;  %v839_v24 = vmax.f32 %v823_v10, %v833_v48  ;;  %v840_v61 = vmax.f32 %v824_v42, %v836_v21 }
 0x5f0   :  { %843 = vrot.lane.b32.xlu1 %v838_v44, %s890_s12  ;;  %845 = vrot.lane.b32.xlu0 %v839_v24, %s890_s12 }
 0x5f4   :  { %847 = vrot.lane.b32.xlu1 %v840_v61, %s890_s12 }
 0x65e   :  { %v842_v28 = vpop.permute.xlu0 %841 }
 0x662   :  { %v844_v58 = vpop.permute.xlu1 %843  ;;  %v846_v2 = vpop.permute.xlu0 %845 }
 0x663   :  { %v851_v3 = vsel %vm245_vm1, %v842_v28, %v844_v58  ;;  %v850_v17 = vsel %vm245_vm1, %v844_v58, %v846_v2 }
 0x664   :  { %v853_v59 = vmax.f32 %v837_v52, %v851_v3  ;;  %v854_v9 = vmax.f32 %v838_v44, %v850_v17 }
 0x666   :  { %v857_v22 = vmax.f32 %v853_v59, 0.0  ;;  %v858_v56 = vmax.f32 %v854_v9, 0.0  ;;  %v848_v34 = vpop.permute.xlu1 %847 }
 0x667   :  { %v849_v55 = vsel %vm245_vm1, %v846_v2, %v848_v34  ;;  %v852_v45 = vsel %vm245_vm1, %v848_v34, %v842_v28 }
 0x668   :  { %861 = vst [vmem:[%s1510_s8] sm:$0xff] %v857_v22  ;;  %862 = vst [vmem:[%s1510_s8 + $0x8] sm:$0xff] %v858_v56  ;;  %v855_v12 = vmax.f32 %v839_v24, %v849_v55  ;;  %v856_v5 = vmax.f32 %v840_v61, %v852_v45 }
 0x66a   :  { %v859_v30 = vmax.f32 %v855_v12, 0.0  ;;  %v860_v32 = vmax.f32 %v856_v5, 0.0 }
 0x66c   :  { %863 = vst [vmem:[%s1510_s8 + $0x10] sm:$0xff] %v859_v30  ;;  %864 = vst [vmem:[%s1510_s8 + $0x18] sm:$0xff] %v860_v32 }

</bundles_post_ra>
